<compile_context>
chip_gen: v6e
topology: v6e:2x2x1
jax: 0.10.0
libtpu: 0.0.40
codegen_flags: <defaults>
</compile_context>

<pallas_src>
import functools
import math

import jax
import jax.numpy as jnp
from jax.experimental import pallas as pl
from jax.experimental.pallas import tpu as pltpu


def _vmem_capacity_bytes():
    try:
        return int(pltpu.get_tpu_info().vmem_capacity_bytes)
    except Exception:
        return 64 << 20  # conservative default (v7x per-TC VMEM)


def _choose_batch_tile(B, T, Din, H, Do):
    """Pick Bt (a divisor of B) and a vmem_limit_bytes for the kernel.

    Per-batch-element live f32 working set: x (double-buffered), out
    (double-buffered), q, k, v, ctx, and s/e which coexist. Weights/biases are
    single-buffered and counted once.
    """
    cap = _vmem_capacity_bytes()
    vmem_limit = int(cap * 0.75)              # ~48 MiB on v7x, ~96 MiB on v5e/v6e

    fixed = 4 * (2 * Din * H + Din * Do + 2 * H + Do)   # single-buffered weights/biases
    per_b = 4 * (2 * T * Din      # x, double-buffered
                 + 2 * T * Do     # out, double-buffered
                 + 2 * T * H      # q, k
                 + 2 * T * Do     # v, ctx
                 + 2 * T * T)     # s, e (both live)

    budget = int(vmem_limit * 0.8) - fixed    # headroom for compiler scratch
    bt_budget = max(1, budget // max(per_b, 4))

    # Aim for >= 4 grid steps when B allows: hides prologue input DMA / epilogue
    # writeback and gives each v7x TensorCore >= 2 steps to double-buffer.
    bt_cap = max(1, -(-B // 4))
    bt_max = max(1, min(bt_budget, bt_cap, B))

    # Largest divisor of B not exceeding bt_max -> no batch padding, no slices.
    bt = 1
    for d in range(1, bt_max + 1):
        if B % d == 0:
            bt = d
    return bt, vmem_limit


def _self_attention_kernel(x_ref, wq_ref, bq_ref, wk_ref, bk_ref, wv_ref,
                           bv_ref, o_ref, *, inv_sqrt_hidden):
    # x_ref: (Bt, T, Din)   wq/wk: (Din, H)   wv: (Din, Do)
    # bq/bk: (1, H)         bv: (1, Do)       o_ref: (Bt, T, Do)
    Bt, T, Din = x_ref.shape
    H = wq_ref.shape[1]
    Do = wv_ref.shape[1]

    # Flatten (Bt, T) so each projection is a single big-M MXU matmul
    # (leading-dim reshape is layout-free when T % 8 == 0).
    x = x_ref[...].astype(jnp.float32).reshape(Bt * T, Din)

    q = (jnp.dot(x, wq_ref[...].astype(jnp.float32),
                 preferred_element_type=jnp.float32)
         + bq_ref[...].astype(jnp.float32)).reshape(Bt, T, H)
    k = (jnp.dot(x, wk_ref[...].astype(jnp.float32),
                 preferred_element_type=jnp.float32)
         + bk_ref[...].astype(jnp.float32)).reshape(Bt, T, H)
    v = (jnp.dot(x, wv_ref[...].astype(jnp.float32),
                 preferred_element_type=jnp.float32)
         + bv_ref[...].astype(jnp.float32)).reshape(Bt, T, Do)

    # Attention scores (batched per element, contraction over H).
    s = jnp.einsum("bqh,bkh->bqk", q, k, preferred_element_type=jnp.float32)

    # Numerically stable softmax over the key axis, normalization deferred.
    m = jnp.max(s, axis=-1, keepdims=True)                 # (Bt, T, 1)
    e = jnp.exp(s - m)                                     # (Bt, T, T)
    denom = jnp.sum(e, axis=-1, keepdims=True)             # (Bt, T, 1)

    # ctx_unnorm = e @ v, then scale by reciprocal(denom) / sqrt(H).
    ctx = jnp.einsum("bqk,bko->bqo", e, v, preferred_element_type=jnp.float32)
    scale = pl.reciprocal(denom) * inv_sqrt_hidden         # exact: holds 1e-5 tol
    o_ref[...] = (ctx * scale).astype(o_ref.dtype)


def self_attention(x, wq, bq, wk, bk, wv, bv, hidden_dim=None):
    """Fused SelfAttention forward (eval mode).

    x: (B, T, Din) f32.  Weights in PyTorch Linear layout: wq/wk: (H, Din),
    wv: (Do, Din); biases bq/bk: (H,), bv: (Do,). Returns (B, T, Do).
    """
    B, T, Din = x.shape
    H = wq.shape[0]
    Do = wv.shape[0]
    if hidden_dim is None:
        hidden_dim = H

    f32 = jnp.float32
    wq_t = wq.T.astype(f32)               # (Din, H)
    wk_t = wk.T.astype(f32)               # (Din, H)
    wv_t = wv.T.astype(f32)               # (Din, Do)
    bq_r = bq.astype(f32).reshape(1, H)
    bk_r = bk.astype(f32).reshape(1, H)
    bv_r = bv.astype(f32).reshape(1, Do)

    Bt, vmem_limit = _choose_batch_tile(B, T, Din, H, Do)

    kernel = functools.partial(
        _self_attention_kernel,
        inv_sqrt_hidden=float(1.0 / math.sqrt(hidden_dim)),
    )

    def build(weight_mode):
        def wspec(shape):
            if weight_mode is None:
                return pl.BlockSpec(shape, lambda i: (0, 0))
            return pl.BlockSpec(shape, lambda i: (0, 0), pipeline_mode=weight_mode)

        return pl.pallas_call(
            kernel,
            out_shape=jax.ShapeDtypeStruct((B, T, Do), x.dtype),
            grid_spec=pltpu.PrefetchScalarGridSpec(
                num_scalar_prefetch=0,
                grid=(B // Bt,),
                in_specs=[
                    pl.BlockSpec((Bt, T, Din), lambda i: (i, 0, 0)),   # activations
                    wspec((Din, H)),   # Wq
                    wspec((1, H)),     # bq
                    wspec((Din, H)),   # Wk
                    wspec((1, H)),     # bk
                    wspec((Din, Do)),  # Wv
                    wspec((1, Do)),    # bv
                ],
                out_specs=pl.BlockSpec((Bt, T, Do), lambda i: (i, 0, 0)),
            ),
            compiler_params=pltpu.CompilerParams(
                dimension_semantics=("parallel",),
                vmem_limit_bytes=vmem_limit,
            ),
        )

    args = (x, wq_t, bq_r, wk_t, bk_r, wv_t, bv_r)
    try:
        # Weights are grid-invariant: single-buffer them to free VMEM for Bt.
        return build(pl.Buffered(1))(*args)
    except Exception:
        # Fallback if this Pallas version rejects buffer_count=1.
        return build(None)(*args)


def _reference(x, wq, bq, wk, bk, wv, bv, hidden_dim):
    # Pure-JAX mirror of the PyTorch forward (eval mode).
    q = x @ wq.T + bq
    k = x @ wk.T + bk
    v = x @ wv.T + bv
    s = jax.nn.softmax(jnp.einsum("bth,bsh->bts", q, k), axis=-1) / math.sqrt(hidden_dim)
    return jnp.einsum("bts,bso->bto", s, v)


if __name__ == "__main__":
    # Small shapes consistent with the module: batch=2, seq=8, dims=32.
    B, T, Din, H, Do = 2, 8, 32, 32, 32

    key = jax.random.PRNGKey(0)
    kx, kwq, kbq, kwk, kbk, kwv, kbv = jax.random.split(key, 7)

    x = jax.random.normal(kx, (B, T, Din), dtype=jnp.float32)
    bound = 1.0 / math.sqrt(Din)
    wq = jax.random.uniform(kwq, (H, Din), minval=-bound, maxval=bound, dtype=jnp.float32)
    bq = jax.random.uniform(kbq, (H,), minval=-bound, maxval=bound, dtype=jnp.float32)
    wk = jax.random.uniform(kwk, (H, Din), minval=-bound, maxval=bound, dtype=jnp.float32)
    bk = jax.random.uniform(kbk, (H,), minval=-bound, maxval=bound, dtype=jnp.float32)
    wv = jax.random.uniform(kwv, (Do, Din), minval=-bound, maxval=bound, dtype=jnp.float32)
    bv = jax.random.uniform(kbv, (Do,), minval=-bound, maxval=bound, dtype=jnp.float32)

    out = self_attention(x, wq, bq, wk, bk, wv, bv, hidden_dim=H)
    out = jax.block_until_ready(out)

    ref = _reference(x, wq, bq, wk, bk, wv, bv, hidden_dim=H)
    assert out.shape == (B, T, Do)
    assert jnp.allclose(out, ref, atol=1e-5, rtol=1e-5), "mismatch vs reference"

    print("KERNEL_OK")
</pallas_src>

<mosaic_0001>
module attributes {stable_mosaic.version = 11 : i64} {
  func.func @_self_attention_kernel(%arg0: i32, %arg1: memref<1x8x32xf32, #tpu.memory_space<vmem>>, %arg2: memref<32x32xf32, #tpu.memory_space<vmem>>, %arg3: memref<1x32xf32, #tpu.memory_space<vmem>>, %arg4: memref<32x32xf32, #tpu.memory_space<vmem>>, %arg5: memref<1x32xf32, #tpu.memory_space<vmem>>, %arg6: memref<32x32xf32, #tpu.memory_space<vmem>>, %arg7: memref<1x32xf32, #tpu.memory_space<vmem>>, %arg8: memref<1x8x32xf32, #tpu.memory_space<vmem>>) attributes {dimension_semantics = [#tpu.dimension_semantics<parallel>], iteration_bounds = array<i64: 2>, scalar_prefetch = 0 : i64, scratch_operands = 0 : i64, tpu.core_type = #tpu.core_type<tc>, window_params = [{transform_indices = @transform_0, window_bounds = array<i64: 1, 8, 32>}, {pipeline_mode = #tpu.pipeline_mode<synchronous>, transform_indices = @transform_1, window_bounds = array<i64: 32, 32>}, {pipeline_mode = #tpu.pipeline_mode<synchronous>, transform_indices = @transform_2, window_bounds = array<i64: 1, 32>}, {pipeline_mode = #tpu.pipeline_mode<synchronous>, transform_indices = @transform_3, window_bounds = array<i64: 32, 32>}, {pipeline_mode = #tpu.pipeline_mode<synchronous>, transform_indices = @transform_4, window_bounds = array<i64: 1, 32>}, {pipeline_mode = #tpu.pipeline_mode<synchronous>, transform_indices = @transform_5, window_bounds = array<i64: 32, 32>}, {pipeline_mode = #tpu.pipeline_mode<synchronous>, transform_indices = @transform_6, window_bounds = array<i64: 1, 32>}, {transform_indices = @transform_7, window_bounds = array<i64: 1, 8, 32>}]} {
    %c0 = arith.constant 0 : index
    %c0_0 = arith.constant 0 : index
    %c0_1 = arith.constant 0 : index
    %0 = vector.load %arg1[%c0, %c0_0, %c0_1] : memref<1x8x32xf32, #tpu.memory_space<vmem>>, vector<1x8x32xf32>
    %1 = vector.shape_cast %0 : vector<1x8x32xf32> to vector<8x32xf32>
    %c0_2 = arith.constant 0 : index
    %c0_3 = arith.constant 0 : index
    %2 = vector.load %arg2[%c0_2, %c0_3] : memref<32x32xf32, #tpu.memory_space<vmem>>, vector<32x32xf32>
    %cst = arith.constant dense<0.000000e+00> : vector<8x32xf32>
    %3 = tpu.matmul %1, %2, %cst {dimension_numbers = #tpu.dot_dimension_numbers<[1], [0], [0], [1], [0, 0, 1, 1], [], []>} : vector<8x32xf32>, vector<32x32xf32>, vector<8x32xf32> -> vector<8x32xf32>
    %c0_4 = arith.constant 0 : index
    %c0_5 = arith.constant 0 : index
    %4 = vector.load %arg3[%c0_4, %c0_5] : memref<1x32xf32, #tpu.memory_space<vmem>>, vector<1x32xf32>
    %5 = vector.broadcast %4 : vector<1x32xf32> to vector<8x32xf32>
    %6 = arith.addf %3, %5 : vector<8x32xf32>
    %7 = vector.shape_cast %6 : vector<8x32xf32> to vector<1x8x32xf32>
    %c0_6 = arith.constant 0 : index
    %c0_7 = arith.constant 0 : index
    %8 = vector.load %arg4[%c0_6, %c0_7] : memref<32x32xf32, #tpu.memory_space<vmem>>, vector<32x32xf32>
    %cst_8 = arith.constant dense<0.000000e+00> : vector<8x32xf32>
    %9 = tpu.matmul %1, %8, %cst_8 {dimension_numbers = #tpu.dot_dimension_numbers<[1], [0], [0], [1], [0, 0, 1, 1], [], []>} : vector<8x32xf32>, vector<32x32xf32>, vector<8x32xf32> -> vector<8x32xf32>
    %c0_9 = arith.constant 0 : index
    %c0_10 = arith.constant 0 : index
    %10 = vector.load %arg5[%c0_9, %c0_10] : memref<1x32xf32, #tpu.memory_space<vmem>>, vector<1x32xf32>
    %11 = vector.broadcast %10 : vector<1x32xf32> to vector<8x32xf32>
    %12 = arith.addf %9, %11 : vector<8x32xf32>
    %13 = vector.shape_cast %12 : vector<8x32xf32> to vector<1x8x32xf32>
    %c0_11 = arith.constant 0 : index
    %c0_12 = arith.constant 0 : index
    %14 = vector.load %arg6[%c0_11, %c0_12] : memref<32x32xf32, #tpu.memory_space<vmem>>, vector<32x32xf32>
    %cst_13 = arith.constant dense<0.000000e+00> : vector<8x32xf32>
    %15 = tpu.matmul %1, %14, %cst_13 {dimension_numbers = #tpu.dot_dimension_numbers<[1], [0], [0], [1], [0, 0, 1, 1], [], []>} : vector<8x32xf32>, vector<32x32xf32>, vector<8x32xf32> -> vector<8x32xf32>
    %c0_14 = arith.constant 0 : index
    %c0_15 = arith.constant 0 : index
    %16 = vector.load %arg7[%c0_14, %c0_15] : memref<1x32xf32, #tpu.memory_space<vmem>>, vector<1x32xf32>
    %17 = vector.broadcast %16 : vector<1x32xf32> to vector<8x32xf32>
    %18 = arith.addf %15, %17 : vector<8x32xf32>
    %19 = vector.shape_cast %18 : vector<8x32xf32> to vector<1x8x32xf32>
    "tpu.trace_start"() <{level = 10 : i32, message = "bqh,bkh->bqk"}> : () -> ()
    %cst_16 = arith.constant dense<0.000000e+00> : vector<1x8x8xf32>
    %20 = tpu.matmul %7, %13, %cst_16 {dimension_numbers = #tpu.dot_dimension_numbers<[2], [2], [1], [1], [0, 0, 0, 1, 1, 1], [0], [0]>} : vector<1x8x32xf32>, vector<1x8x32xf32>, vector<1x8x8xf32> -> vector<1x8x8xf32>
    "tpu.trace_stop"() : () -> ()
    %cst_17 = arith.constant dense<0xFF800000> : vector<1x8xf32>
    %21 = vector.multi_reduction <maximumf>, %20, %cst_17 [2] : vector<1x8x8xf32> to vector<1x8xf32>
    %22 = vector.shape_cast %21 : vector<1x8xf32> to vector<1x8x1xf32>
    %23 = vector.broadcast %22 : vector<1x8x1xf32> to vector<1x8x8xf32>
    %24 = arith.subf %20, %23 : vector<1x8x8xf32>
    %25 = math.exp %24 : vector<1x8x8xf32>
    %cst_18 = arith.constant dense<0.000000e+00> : vector<1x8xf32>
    %26 = vector.multi_reduction <add>, %25, %cst_18 [2] : vector<1x8x8xf32> to vector<1x8xf32>
    %27 = vector.shape_cast %26 : vector<1x8xf32> to vector<1x8x1xf32>
    "tpu.trace_start"() <{level = 10 : i32, message = "bqk,bko->bqo"}> : () -> ()
    %cst_19 = arith.constant dense<0.000000e+00> : vector<1x8x32xf32>
    %28 = tpu.matmul %25, %19, %cst_19 {dimension_numbers = #tpu.dot_dimension_numbers<[2], [1], [1], [2], [0, 0, 0, 1, 1, 2], [0], [0]>} : vector<1x8x8xf32>, vector<1x8x32xf32>, vector<1x8x32xf32> -> vector<1x8x32xf32>
    "tpu.trace_stop"() : () -> ()
    %29 = tpu.reciprocal %27 : vector<1x8x1xf32> -> vector<1x8x1xf32>
    %cst_20 = arith.constant 0.176776692 : f32
    %30 = vector.broadcast %cst_20 : f32 to vector<1x8x1xf32>
    %31 = arith.mulf %29, %30 : vector<1x8x1xf32>
    %32 = vector.broadcast %31 : vector<1x8x1xf32> to vector<1x8x32xf32>
    %33 = arith.mulf %28, %32 : vector<1x8x32xf32>
    %c0_21 = arith.constant 0 : index
    %c0_22 = arith.constant 0 : index
    %c0_23 = arith.constant 0 : index
    %34 = vector.load %arg8[%c0_21, %c0_22, %c0_23] : memref<1x8x32xf32, #tpu.memory_space<vmem>>, vector<1x8x32xf32>
    tpu.vector_store %arg8[%c0_21, %c0_22, %c0_23], %33 {strides = array<i32>} : memref<1x8x32xf32, #tpu.memory_space<vmem>>, vector<1x8x32xf32>,
    return
  }
  func.func @transform_0(%arg0: i32) -> (i32, i32, i32) {
    %c0_i32 = arith.constant 0 : i32
    %c0_i32_0 = arith.constant 0 : i32
    %c0_i32_1 = arith.constant 0 : i32
    return %arg0, %c0_i32, %c0_i32_0 : i32, i32, i32
  }
  func.func @transform_1(%arg0: i32) -> (i32, i32) {
    %c0_i32 = arith.constant 0 : i32
    %c0_i32_0 = arith.constant 0 : i32
    %c0_i32_1 = arith.constant 0 : i32
    return %c0_i32, %c0_i32_0 : i32, i32
  }
  func.func @transform_2(%arg0: i32) -> (i32, i32) {
    %c0_i32 = arith.constant 0 : i32
    %c0_i32_0 = arith.constant 0 : i32
    %c0_i32_1 = arith.constant 0 : i32
    return %c0_i32, %c0_i32_0 : i32, i32
  }
  func.func @transform_3(%arg0: i32) -> (i32, i32) {
    %c0_i32 = arith.constant 0 : i32
    %c0_i32_0 = arith.constant 0 : i32
    %c0_i32_1 = arith.constant 0 : i32
    return %c0_i32, %c0_i32_0 : i32, i32
  }
  func.func @transform_4(%arg0: i32) -> (i32, i32) {
    %c0_i32 = arith.constant 0 : i32
    %c0_i32_0 = arith.constant 0 : i32
    %c0_i32_1 = arith.constant 0 : i32
    return %c0_i32, %c0_i32_0 : i32, i32
  }
  func.func @transform_5(%arg0: i32) -> (i32, i32) {
    %c0_i32 = arith.constant 0 : i32
    %c0_i32_0 = arith.constant 0 : i32
    %c0_i32_1 = arith.constant 0 : i32
    return %c0_i32, %c0_i32_0 : i32, i32
  }
  func.func @transform_6(%arg0: i32) -> (i32, i32) {
    %c0_i32 = arith.constant 0 : i32
    %c0_i32_0 = arith.constant 0 : i32
    %c0_i32_1 = arith.constant 0 : i32
    return %c0_i32, %c0_i32_0 : i32, i32
  }
  func.func @transform_7(%arg0: i32) -> (i32, i32, i32) {
    %c0_i32 = arith.constant 0 : i32
    %c0_i32_0 = arith.constant 0 : i32
    %c0_i32_1 = arith.constant 0 : i32
    return %arg0, %c0_i32, %c0_i32_0 : i32, i32, i32
  }
}

module attributes {stable_mosaic.version = 11 : i64} {
  func.func @_self_attention_kernel(%arg0: i32, %arg1: memref<1x8x32xf32, #tpu.memory_space<vmem>>, %arg2: memref<32x32xf32, #tpu.memory_space<vmem>>, %arg3: memref<1x32xf32, #tpu.memory_space<vmem>>, %arg4: memref<32x32xf32, #tpu.memory_space<vmem>>, %arg5: memref<1x32xf32, #tpu.memory_space<vmem>>, %arg6: memref<32x32xf32, #tpu.memory_space<vmem>>, %arg7: memref<1x32xf32, #tpu.memory_space<vmem>>, %arg8: memref<1x8x32xf32, #tpu.memory_space<vmem>>) attributes {dimension_semantics = [#tpu.dimension_semantics<parallel>], iteration_bounds = array<i64: 2>, scalar_prefetch = 0 : i64, scratch_operands = 0 : i64, tpu.core_type = #tpu.core_type<tc>, window_params = [{transform_indices = @transform_0, window_bounds = array<i64: 1, 8, 32>}, {pipeline_mode = #tpu.pipeline_mode<synchronous>, transform_indices = @transform_1, window_bounds = array<i64: 32, 32>}, {pipeline_mode = #tpu.pipeline_mode<synchronous>, transform_indices = @transform_2, window_bounds = array<i64: 1, 32>}, {pipeline_mode = #tpu.pipeline_mode<synchronous>, transform_indices = @transform_3, window_bounds = array<i64: 32, 32>}, {pipeline_mode = #tpu.pipeline_mode<synchronous>, transform_indices = @transform_4, window_bounds = array<i64: 1, 32>}, {pipeline_mode = #tpu.pipeline_mode<synchronous>, transform_indices = @transform_5, window_bounds = array<i64: 32, 32>}, {pipeline_mode = #tpu.pipeline_mode<synchronous>, transform_indices = @transform_6, window_bounds = array<i64: 1, 32>}, {transform_indices = @transform_7, window_bounds = array<i64: 1, 8, 32>}]} {
    %c0 = arith.constant 0 : index
    %c0_0 = arith.constant 0 : index
    %c0_1 = arith.constant 0 : index
    %0 = vector.load %arg1[%c0, %c0_0, %c0_1] : memref<1x8x32xf32, #tpu.memory_space<vmem>>, vector<1x8x32xf32>
    %1 = vector.shape_cast %0 : vector<1x8x32xf32> to vector<8x32xf32>
    %c0_2 = arith.constant 0 : index
    %c0_3 = arith.constant 0 : index
    %2 = vector.load %arg2[%c0_2, %c0_3] : memref<32x32xf32, #tpu.memory_space<vmem>>, vector<32x32xf32>
    %cst = arith.constant dense<0.000000e+00> : vector<8x32xf32>
    %3 = tpu.matmul %1, %2, %cst {dimension_numbers = #tpu.dot_dimension_numbers<[1], [0], [0], [1], [0, 0, 1, 1], [], []>} : vector<8x32xf32>, vector<32x32xf32>, vector<8x32xf32> -> vector<8x32xf32>
    %c0_4 = arith.constant 0 : index
    %c0_5 = arith.constant 0 : index
    %4 = vector.load %arg3[%c0_4, %c0_5] : memref<1x32xf32, #tpu.memory_space<vmem>>, vector<1x32xf32>
    %5 = vector.broadcast %4 : vector<1x32xf32> to vector<8x32xf32>
    %6 = arith.addf %3, %5 : vector<8x32xf32>
    %7 = vector.shape_cast %6 : vector<8x32xf32> to vector<1x8x32xf32>
    %c0_6 = arith.constant 0 : index
    %c0_7 = arith.constant 0 : index
    %8 = vector.load %arg4[%c0_6, %c0_7] : memref<32x32xf32, #tpu.memory_space<vmem>>, vector<32x32xf32>
    %cst_8 = arith.constant dense<0.000000e+00> : vector<8x32xf32>
    %9 = tpu.matmul %1, %8, %cst_8 {dimension_numbers = #tpu.dot_dimension_numbers<[1], [0], [0], [1], [0, 0, 1, 1], [], []>} : vector<8x32xf32>, vector<32x32xf32>, vector<8x32xf32> -> vector<8x32xf32>
    %c0_9 = arith.constant 0 : index
    %c0_10 = arith.constant 0 : index
    %10 = vector.load %arg5[%c0_9, %c0_10] : memref<1x32xf32, #tpu.memory_space<vmem>>, vector<1x32xf32>
    %11 = vector.broadcast %10 : vector<1x32xf32> to vector<8x32xf32>
    %12 = arith.addf %9, %11 : vector<8x32xf32>
    %13 = vector.shape_cast %12 : vector<8x32xf32> to vector<1x8x32xf32>
    %c0_11 = arith.constant 0 : index
    %c0_12 = arith.constant 0 : index
    %14 = vector.load %arg6[%c0_11, %c0_12] : memref<32x32xf32, #tpu.memory_space<vmem>>, vector<32x32xf32>
    %cst_13 = arith.constant dense<0.000000e+00> : vector<8x32xf32>
    %15 = tpu.matmul %1, %14, %cst_13 {dimension_numbers = #tpu.dot_dimension_numbers<[1], [0], [0], [1], [0, 0, 1, 1], [], []>} : vector<8x32xf32>, vector<32x32xf32>, vector<8x32xf32> -> vector<8x32xf32>
    %c0_14 = arith.constant 0 : index
    %c0_15 = arith.constant 0 : index
    %16 = vector.load %arg7[%c0_14, %c0_15] : memref<1x32xf32, #tpu.memory_space<vmem>>, vector<1x32xf32>
    %17 = vector.broadcast %16 : vector<1x32xf32> to vector<8x32xf32>
    %18 = arith.addf %15, %17 : vector<8x32xf32>
    %19 = vector.shape_cast %18 : vector<8x32xf32> to vector<1x8x32xf32>
    "tpu.trace_start"() <{level = 10 : i32, message = "bqh,bkh->bqk"}> : () -> ()
    %cst_16 = arith.constant dense<0.000000e+00> : vector<1x8x8xf32>
    %20 = tpu.matmul %7, %13, %cst_16 {dimension_numbers = #tpu.dot_dimension_numbers<[2], [2], [1], [1], [0, 0, 0, 1, 1, 1], [0], [0]>} : vector<1x8x32xf32>, vector<1x8x32xf32>, vector<1x8x8xf32> -> vector<1x8x8xf32>
    "tpu.trace_stop"() : () -> ()
    %cst_17 = arith.constant dense<0xFF800000> : vector<1x8xf32>
    %21 = vector.multi_reduction <maximumf>, %20, %cst_17 [2] : vector<1x8x8xf32> to vector<1x8xf32>
    %22 = vector.shape_cast %21 : vector<1x8xf32> to vector<1x8x1xf32>
    %23 = vector.broadcast %22 : vector<1x8x1xf32> to vector<1x8x8xf32>
    %24 = arith.subf %20, %23 : vector<1x8x8xf32>
    %25 = math.exp %24 : vector<1x8x8xf32>
    %cst_18 = arith.constant dense<0.000000e+00> : vector<1x8xf32>
    %26 = vector.multi_reduction <add>, %25, %cst_18 [2] : vector<1x8x8xf32> to vector<1x8xf32>
    %27 = vector.shape_cast %26 : vector<1x8xf32> to vector<1x8x1xf32>
    "tpu.trace_start"() <{level = 10 : i32, message = "bqk,bko->bqo"}> : () -> ()
    %cst_19 = arith.constant dense<0.000000e+00> : vector<1x8x32xf32>
    %28 = tpu.matmul %25, %19, %cst_19 {dimension_numbers = #tpu.dot_dimension_numbers<[2], [1], [1], [2], [0, 0, 0, 1, 1, 2], [0], [0]>} : vector<1x8x8xf32>, vector<1x8x32xf32>, vector<1x8x32xf32> -> vector<1x8x32xf32>
    "tpu.trace_stop"() : () -> ()
    %29 = tpu.reciprocal %27 : vector<1x8x1xf32> -> vector<1x8x1xf32>
    %cst_20 = arith.constant 0.176776692 : f32
    %30 = vector.broadcast %cst_20 : f32 to vector<1x8x1xf32>
    %31 = arith.mulf %29, %30 : vector<1x8x1xf32>
    %32 = vector.broadcast %31 : vector<1x8x1xf32> to vector<1x8x32xf32>
    %33 = arith.mulf %28, %32 : vector<1x8x32xf32>
    %c0_21 = arith.constant 0 : index
    %c0_22 = arith.constant 0 : index
    %c0_23 = arith.constant 0 : index
    %34 = vector.load %arg8[%c0_21, %c0_22, %c0_23] : memref<1x8x32xf32, #tpu.memory_space<vmem>>, vector<1x8x32xf32>
    tpu.vector_store %arg8[%c0_21, %c0_22, %c0_23], %33 {strides = array<i32>} : memref<1x8x32xf32, #tpu.memory_space<vmem>>, vector<1x8x32xf32>,
    return
  }
  func.func @transform_0(%arg0: i32) -> (i32, i32, i32) {
    %c0_i32 = arith.constant 0 : i32
    %c0_i32_0 = arith.constant 0 : i32
    %c0_i32_1 = arith.constant 0 : i32
    return %arg0, %c0_i32, %c0_i32_0 : i32, i32, i32
  }
  func.func @transform_1(%arg0: i32) -> (i32, i32) {
    %c0_i32 = arith.constant 0 : i32
    %c0_i32_0 = arith.constant 0 : i32
    %c0_i32_1 = arith.constant 0 : i32
    return %c0_i32, %c0_i32_0 : i32, i32
  }
  func.func @transform_2(%arg0: i32) -> (i32, i32) {
    %c0_i32 = arith.constant 0 : i32
    %c0_i32_0 = arith.constant 0 : i32
    %c0_i32_1 = arith.constant 0 : i32
    return %c0_i32, %c0_i32_0 : i32, i32
  }
  func.func @transform_3(%arg0: i32) -> (i32, i32) {
    %c0_i32 = arith.constant 0 : i32
    %c0_i32_0 = arith.constant 0 : i32
    %c0_i32_1 = arith.constant 0 : i32
    return %c0_i32, %c0_i32_0 : i32, i32
  }
  func.func @transform_4(%arg0: i32) -> (i32, i32) {
    %c0_i32 = arith.constant 0 : i32
    %c0_i32_0 = arith.constant 0 : i32
    %c0_i32_1 = arith.constant 0 : i32
    return %c0_i32, %c0_i32_0 : i32, i32
  }
  func.func @transform_5(%arg0: i32) -> (i32, i32) {
    %c0_i32 = arith.constant 0 : i32
    %c0_i32_0 = arith.constant 0 : i32
    %c0_i32_1 = arith.constant 0 : i32
    return %c0_i32, %c0_i32_0 : i32, i32
  }
  func.func @transform_6(%arg0: i32) -> (i32, i32) {
    %c0_i32 = arith.constant 0 : i32
    %c0_i32_0 = arith.constant 0 : i32
    %c0_i32_1 = arith.constant 0 : i32
    return %c0_i32, %c0_i32_0 : i32, i32
  }
  func.func @transform_7(%arg0: i32) -> (i32, i32, i32) {
    %c0_i32 = arith.constant 0 : i32
    %c0_i32_0 = arith.constant 0 : i32
    %c0_i32_1 = arith.constant 0 : i32
    return %arg0, %c0_i32, %c0_i32_0 : i32, i32, i32
  }
}

</mosaic_0001>

<bundles_post_ra>
// kernel: tpu_custom_call.1
= control target key start
LH: loop header
LB: loop body
LE: loop exit
PB: predicated region body
PF: predicated region fallthrough
CT: control target
= control target key end

     0   :  { %s1478_s0 = inlined_call_operand.hbm [shape: f32[2,8,32], index: 0, kind: input, shape index: {}]   ;;  %s1479_s1 = inlined_call_operand.hbm [shape: f32[32,32], index: 1, kind: input, shape index: {}]   ;;  %s1480_s2 = inlined_call_operand.vmem [shape: f32[1,32], index: 2, kind: input, shape index: {}]   ;;  %s1481_s3 = inlined_call_operand.hbm [shape: f32[32,32], index: 3, kind: input, shape index: {}]   ;;  %s1482_s4 = inlined_call_operand.vmem [shape: f32[1,32], index: 4, kind: input, shape index: {}]   ;;  %s1483_s5 = inlined_call_operand.hbm [shape: f32[32,32], index: 5, kind: input, shape index: {}]   ;;  %s1484_s6 = inlined_call_operand.vmem [shape: f32[1,32], index: 6, kind: input, shape index: {}]   ;;  %s1485_s7 = inlined_call_operand.hbm [shape: f32[2,8,32], index: 7, kind: output, shape index: {}]  }
   0x1   :  { %1490 = sst [smem:[#allocation15_spill]] %s1479_s1 }
   0x2   :  { %1491 = sst [smem:[#allocation16_spill]] %s1481_s3 }
   0x3   :  { %12 = vsyncpa [#allocation3], 0 }
   0x4   :  { %14 = vsyncpa [#allocation3 + $0x1], 0 }
   0x5   :  { %15 = vsyncpa [#allocation6], 0 }
   0x6   :  { %16 = vsyncpa [#allocation9], 0 }
   0x7   :  { %17 = vsyncpa [#allocation4], 0 }
   0x8   :  { %19 = vsyncpa [#allocation4 + $0x1], 0  ;;  %s1265_s24 = smov 0   ;;  %s1267_s25 = smov 0  }
   0x9   :  { %s1269_s26 = smov 0   ;;  %s1271_s27 = smov 0  }
   0xa LB: > { %s1286_s28 = sadd.s32 4294967295, %s1214_s27   ;;  %s862_s29 = sadd.s32 4294967294, %s1214_s27   ;;  %s1214_s27 = sphi %s1271_s27, %s1513_s27   ;;  %s1210_s26 = sphi %s1269_s26, %s1512_s26   ;;  %s1206_s25 = sphi %s1267_s25, %s1511_s25   ;;  %s1202_s24 = sphi %s1265_s24, %s1510_s24  }
   0xb   : > { %p45_p0 = scmp.ne.s32.totalorder %s1206_s25, %s1202_s24  ;;  %p1486_p1 = scmp.eq.s32.totalorder %s1286_s28, 0 }
   0xc   : > { %p201_p3 = scmp.eq.s32.totalorder %s862_s29, 1  ;;  %p863_p5 = scmp.ge.s32.totalorder %s1214_s27, 1 }
   0xd   : > { %p1295_p4 = por %p1486_p1, %p45_p0  ;;  %p208_p7 = scmp.lt.s32.totalorder %s1214_s27, 3 }
   0xe   : > { %p1300_p6 = por %p201_p3, %p45_p0  ;;  %s1216_s10 = smov [#allocation5]  }
   0xf   : > { %s1492_s30 = scalar_select %p1295_p4, 1, 0 }
  0x10   : > { %s1493_s8 = scalar_select %p1300_p6, 1, 0 }
  0x11   : > { %p1305_p8 = pnand %p863_p5, %p208_p7  ;;  %s220_s11 = sshll.u32 %s1216_s10, 4  ;;  %s221_s11 = int_to_ptr.vmem [resolvable:$true] %s220_s11 }
  0x12   : > { %s1217_s13 = smov [#allocation7]   ;;  %s1218_s15 = smov [#allocation8]  }
  0x13   : > { %s1494_s9 = scalar_select %p1305_p8, 1, 0 }
  0x14   : > { %p967_p9 = pneg %p1305_p8  ;;  %s236_s14 = sshll.u32 %s1217_s13, 4  ;;  %s237_s14 = int_to_ptr.vmem [resolvable:$true] %s236_s14 }
  0x15   : > { %s252_s16 = sshll.u32 %s1218_s15, 4  ;;  %s1047_s17 = scalar_lea.vmem %s221_s11, 512  ;;  %s253_s16 = int_to_ptr.vmem [resolvable:$true] %s252_s16 }
  0x16   : > { %p1314_p11 = pnand %p967_p9, %p1486_p1  ;;  %p1048_p13 = scmp.ne.s32.totalorder %s221_s11, %s1047_s17 }
  0x17   : > { %p1055_p5 = scmp.lt.s32.totalorder %s221_s11, %s221_s11  ;;  %p1056_p7 = scmp.lt.s32.totalorder %s1047_s17, %s1047_s17 }
  0x18   : > { %p1038_p12 = pneg %p1314_p11 }
  0x19   : > { %p1057_p9 = por %p1056_p7, %p1055_p5 }
  0x1a   : > { %p1050_p0 = pnand %p1048_p13, %p1038_p12 }
  0x1c   : > { %p1051_p3 = pneg %p1050_p0 }
  0x1e   : > { %p1058_p10 = pnand %p1057_p9, %p1051_p3 }
  0x20   : > { %1061 = shalt.err (!%p1058_p10)
}
  0x21   : > { %s1219_s18 = smov 128   ;;  %s1220_s19 = smov 8  }
  0x22   : > { %s1496_s1 = sld [smem:[#allocation15_spill]]  ;;  %s1073_s22 = scalar_lea.vmem %s237_s14, 512 }
  0x23   : > { %p1074_p1 = scmp.ne.s32.totalorder %s237_s14, %s1073_s22  ;;  %p1081_p2 = scmp.lt.s32.totalorder %s237_s14, %s237_s14 }
  0x24   : > { %p1082_p6 = scmp.lt.s32.totalorder %s1073_s22, %s1073_s22 }
  0x25   : > { %p1076_p13 = pnand %p1074_p1, %p1038_p12 }
  0x26   : > { %p1083_p5 = por %p1082_p6, %p1081_p2 }
  0x27   : > { %p1077_p0 = pneg %p1076_p13 }
  0x28   : > { %970 = dma.hbm_to_vmem [thread:$0]  (!%p1314_p11), %s1496_s1, 512, %s221_s11, [#allocation6], %s1219_s18, %s1219_s18, %s1220_s19  }
  0x29   : > { %p1084_p3 = pnand %p1083_p5, %p1077_p0 }
  0x2b   : > { %1087 = shalt.err (!%p1084_p3)
}
  0x2c   : > { %s1497_s3 = sld [smem:[#allocation16_spill]]  ;;  %s1099_s10 = scalar_lea.vmem %s253_s16, 512 }
  0x2d   : > { %p1100_p10 = scmp.ne.s32.totalorder %s253_s16, %s1099_s10  ;;  %p1107_p9 = scmp.lt.s32.totalorder %s253_s16, %s253_s16 }
  0x2e   : > { %p1108_p13 = scmp.lt.s32.totalorder %s1099_s10, %s1099_s10 }
  0x2f   : > { %p1102_p7 = pnand %p1100_p10, %p1038_p12 }
  0x30   : > { %p1109_p4 = por %p1108_p13, %p1107_p9 }
  0x31   : > { %p1103_p1 = pneg %p1102_p7 }
  0x32   : > { %973 = dma.hbm_to_vmem [thread:$0]  (!%p1314_p11), %s1497_s3, 512, %s237_s14, [#allocation6], %s1219_s18, %s1219_s18, %s1220_s19  }
  0x33   : > { %p1110_p2 = pnand %p1109_p4, %p1103_p1 }
  0x35   : > { %1113 = shalt.err (!%p1110_p2)
}
  0x36   : > { %976 = dma.hbm_to_vmem [thread:$0]  (!%p1314_p11), %s1483_s5, 512, %s253_s16, [#allocation9], %s1219_s18, %s1219_s18, %s1220_s19  }
  0x37   : > { %s1345_s14 = sadd.s32 1, %s1214_s27   ;;  %s32_s12 = sadd.s32 1, %s1210_s26 }
  0x38   : > { %s29_s15 = ssub.s32 %s1214_s27, %s1345_s14  ;;  %p39_p6 = scmp.ne.s32.totalorder %s1210_s26, %s1206_s25 }
  0x39   : > { %p30_p4 = scmp.eq.s32.totalorder %s29_s15, 0  ;;  %p40_p12 = scmp.eq.s32.totalorder %s1214_s27, 0 }
  0x3a   : > { %p988_p0 = scmp.lt.s32.totalorder %s1214_s27, 2  ;;  %p1498_p3 = scmp.eq.s32.totalorder %s1286_s28, 1 }
  0x3b   : > { %s1355_s17 = scalar_select %p30_p4, %s1210_s26, %s32_s12  }
  0x3c   : > { %p41_p5 = por %p40_p12, %p39_p6  ;;  %p1359_p10 = por %p1498_p3, %p39_p6 }
  0x3d   : > { %s269_s21 = sand.u32 1, %s1210_s26   ;;  %s869_s22 = sshll.u32 %s1214_s27, 7 }
  0x3e   : > { %s1499_s20 = scalar_select %p1359_p10, 1, 0 }
  0x3f   : > { %s868_s16 = sshll.u32 %s269_s21, 3  ;;  %s1368_s23 = scalar_lea.hbm %s1478_s0, %s869_s22 }
  0x40   : > { %s273_s29 = scalar_lea.vmem [#allocation2], %s868_s16  ;;  %p1370_p11 = pnand %p988_p0, %p41_p5 }
  0x41   : > { %s280_s10 = sshll.u32 %s273_s29, 4  ;;  %s270_s13 = scalar_lea.sflag [#allocation3], %s269_s21  ;;  %s281_s10 = int_to_ptr.vmem [resolvable:$true] %s280_s10 }
  0x42   : > { %s1114_s15 = scalar_lea.hbm %s1368_s23, 128  ;;  %p1116_p1 = pneg %p1370_p11 }
  0x43   : > { %p1115_p7 = scmp.ne.s32.totalorder %s1368_s23, %s1114_s15  ;;  %s1119_s18 = scalar_lea.hbm %s1478_s0, 256 }
  0x44   : > { %p1120_p2 = scmp.lt.s32.totalorder %s1368_s23, %s1478_s0  ;;  %p1121_p4 = scmp.lt.s32.totalorder %s1119_s18, %s1114_s15 }
  0x45   : > { %p1117_p9 = pnand %p1116_p1, %p1115_p7 }
  0x46   : > { %p1122_p6 = por %p1121_p4, %p1120_p2 }
  0x47   : > { %p1118_p13 = pneg %p1117_p9 }
  0x49   : > { %p1123_p12 = pnand %p1122_p6, %p1118_p13 }
  0x4b   : > { %1126 = shalt.err (!%p1123_p12)
}
  0x4c   : > { %s1127_s29 = scalar_lea.vmem %s281_s10, 128  ;;  %s1221_s21 = smov [#allocation2]  }
  0x4d   : > { %p1128_p0 = scmp.ne.s32.totalorder %s281_s10, %s1127_s29  ;;  %s1132_s1 = sshll.u32 %s1221_s21, 4  ;;  %s1133_s1 = int_to_ptr.vmem [resolvable:$false] %s1132_s1 }
  0x4e   : > { %s1134_s3 = scalar_lea.vmem %s1133_s1, 256  ;;  %p1135_p7 = scmp.lt.s32.totalorder %s281_s10, %s1133_s1 }
  0x4f   : > { %p1130_p5 = pnand %p1128_p0, %p1116_p1  ;;  %p1136_p9 = scmp.lt.s32.totalorder %s1134_s3, %s1127_s29 }
  0x51   : > { %p1131_p3 = pneg %p1130_p5  ;;  %p1137_p10 = por %p1136_p9, %p1135_p7 }
  0x53   : > { %p1138_p8 = pnand %p1137_p10, %p1131_p3 }
  0x55   : > { %1141 = shalt.err (!%p1138_p8)
}
  0x56   : > { %980 = dma.hbm_to_vmem [thread:$0]  (!%p1370_p11), %s1368_s23, 128, %s281_s10, %s270_s13  }
  0x57   : > { %p1501_p13 = scmp.ne.s32.totalorder %s1494_s9, 0 }
  0x58   : > { %s1391_s15 = sand.u32 (!%p1501_p13), 1, %s1206_s25   ;;  %p1502_p8 = scmp.ne.s32.totalorder (!%p1501_p13), %s1492_s30, 0 }
  0x59   : > { %289 = sbr.rel (%p1501_p13) target bundleno = 867 (0x363), region = 48  ;;  %s871_s12 = sshll.u32 (!%p1501_p13), %s1391_s15, 3 }
  0x5a   : > { %s292_s1 = scalar_lea.sflag (!%p1501_p13), [#allocation3], %s1391_s15  ;;  %s1397_s3 = scalar_lea.vmem (!%p1501_p13), [#allocation2], %s871_s12 }
  0x5e   : > { %1185 = dma.done.wait (%p1502_p8), %s292_s1, 128  }
  0x5f   : > { %1187 = vsyncadd (%p1502_p8), %s292_s1, 4294967168  ;;  %p1503_p10 = scmp.eq.s32.totalorder %s1286_s28, 0 }
  0x61   : > { %1189 = dma.done.wait (%p1503_p10), [#allocation6], 1024   ;;  %p1504_p11 = pmov %p1503_p10 }
  0x62   : > { %p1505_p1 = pmov %p1503_p10 }
  0x63   : > { %1191 = vsyncadd (%p1504_p11), [#allocation6], 4294966272 }
  0x64   : > { %1193 = dma.done.wait (%p1505_p1), [#allocation9], 512   ;;  %p1506_p2 = pmov %p1505_p1 }
  0x65   : > { %v1222_v0 = vmov 0.0   ;;  %vm1223_vm0 = vmmov 0   ;;  %v427_v1 = vld [vmem:[#allocation7 + $0x18] sm:$0xff]  ;;  %v426_v3 = vld [vmem:[#allocation7 + $0x10] sm:$0xff]  ;;  %v425_v5 = vld [vmem:[#allocation7 + $0x8] sm:$0xff]  ;;  %vm350_vm1 = vcmask 261120  }
  0x66   : > { %1195 = vsyncadd (%p1506_p2), [#allocation9], 4294966784  ;;  %919 = vmatprep.subr.mxu1 %v1222_v0  ;;  %908 = vmatprep.subr.mxu0 %v1222_v0  ;;  %v342_v2 = vld [vmem:[#allocation5 + $0x18] sm:$0xff]  ;;  %v341_v4 = vld [vmem:[#allocation5 + $0x10] sm:$0xff]  ;;  %vm662_vm2 = vcmask 64512   ;;  %s886_s22 = sshll.u32 %s1286_s28, 7 }
  0x67   : > { %927 = vmatprep.mubr.msk.f32.mxu1 %vm1223_vm0, %v1222_v0  ;;  %916 = vmatprep.mubr.msk.f32.mxu0 %vm1223_vm0, %v1222_v0  ;;  %v340_v6 = vld [vmem:[#allocation5 + $0x8] sm:$0xff]  ;;  %v424_v7 = vld [vmem:[#allocation7] sm:$0xff]  ;;  %v338_v9 = vld [vmem:[%s1397_s3] sm:$0xff]  ;;  %s337_s18 = scalar_lea.vmem [#allocation10], %s871_s12  ;;  %s1440_s21 = scalar_lea.hbm %s1485_s7, %s886_s22 }
  0x68   : > { %920 = vmatpush3.msra.mxu1 %v427_v1  ;;  %909 = vmatpush3.msra.mxu0 %v342_v2  ;;  %v339_v8 = vld [vmem:[#allocation5] sm:$0xff]  ;;  %v508_v10 = vld [vmem:[#allocation8 + $0x18] sm:$0xff]  ;;  %v507_v11 = vld [vmem:[#allocation8 + $0x10] sm:$0xff]  ;;  %s763_s19 = sshll.u32 %s337_s18, 4  ;;  %s750_s1 = scalar_lea.sflag [#allocation4], %s1391_s15  ;;  %s764_s19 = int_to_ptr.vmem [resolvable:$true] %s763_s19 }
  0x69   : > { %921 = vmatprep.subr.mxu1 %v1222_v0  ;;  %910 = vmatprep.subr.mxu0 %v1222_v0  ;;  %v506_v12 = vld [vmem:[#allocation8 + $0x8] sm:$0xff]  ;;  %v505_v13 = vld [vmem:[#allocation8] sm:$0xff]  ;;  %v878_v14 = vld [vmem:[%s1482_s4] ss:$0 sm:$0xff]  ;;  %s1142_s3 = scalar_lea.vmem %s764_s19, 128  ;;  %p1507_p6 = scmp.ne.s32.totalorder %s1499_s20, 0 }
  0x6a   : > { %922 = vmatpush3.msra.mxu1 %v426_v3  ;;  %911 = vmatpush3.msra.mxu0 %v341_v4  ;;  %v876_v15 = vld [vmem:[%s1480_s2] ss:$0 sm:$0xff]  ;;  %p1143_p4 = scmp.ne.s32.totalorder %s764_s19, %s1142_s3  ;;  %s1224_s28 = smov [#allocation10]  }
  0x6b   : > { %923 = vmatprep.subr.mxu1 %v1222_v0  ;;  %912 = vmatprep.subr.mxu0 %v1222_v0  ;;  %v880_v25 = vld [vmem:[%s1484_s6] ss:$0 sm:$0xff]  ;;  %s1146_s12 = sshll.u32 %s1224_s28, 4  ;;  %s1147_s12 = int_to_ptr.vmem [resolvable:$false] %s1146_s12 }
  0x6c   : > { %924 = vmatpush3.msra.mxu1 %v425_v5  ;;  %913 = vmatpush3.msra.mxu0 %v340_v6  ;;  %p1144_p12 = pnand %p1143_p4, %p1507_p6  ;;  %s1148_s30 = scalar_lea.vmem %s1147_s12, 256 }
  0x6d   : > { %925 = vmatprep.subr.mxu1 %v1222_v0  ;;  %914 = vmatprep.subr.mxu0 %v1222_v0  ;;  %p1149_p5 = scmp.lt.s32.totalorder %s764_s19, %s1147_s12  ;;  %p1150_p3 = scmp.lt.s32.totalorder %s1148_s30, %s1142_s3 }
  0x6e   : > { %926 = vmatpush3.msra.mxu1 %v424_v7  ;;  %915 = vmatpush3.msra.mxu0 %v339_v8  ;;  %p1145_p0 = pneg %p1144_p12 }
  0x6f   : > { %928 = vmatmul.mubr.msk.f32.vlgmr.msra.gmra.mxu1 %vm350_vm1, %v338_v9  ;;  %917 = vmatmul.mubr.msk.f32.vlgmr.msra.gmra.mxu0 %vm350_vm1, %v338_v9  ;;  %p1151_p7 = por %p1150_p3, %p1149_p5 }
  0x70   : > { %941 = vmatprep.subr.mxu1 %v1222_v0  ;;  %943 = vmatprep.mubr.msk.f32.mxu1 %vm1223_vm0, %v1222_v0 }
  0x71   : > { %930 = vmatprep.subr.mxu0 %v1222_v0  ;;  %938 = vmatprep.mubr.msk.f32.mxu0 %vm1223_vm0, %v1222_v0  ;;  %p1152_p9 = pnand %p1151_p7, %p1145_p0 }
  0x72   : > { %931 = vmatpush3.msra.mxu0 %v508_v10 }
  0x73   : > { %932 = vmatprep.subr.mxu0 %v1222_v0 }
  0x74   : > { %933 = vmatpush3.msra.mxu0 %v507_v11 }
  0x75   : > { %934 = vmatprep.subr.mxu0 %v1222_v0 }
  0x76   : > { %935 = vmatpush3.msra.mxu0 %v506_v12 }
  0x77   : > { %936 = vmatprep.subr.mxu0 %v1222_v0 }
  0x78   : > { %937 = vmatpush3.msra.mxu0 %v505_v13 }
  0x79   : > { %939 = vmatmul.mubr.msk.f32.vlgmr.msra.gmra.mxu0 %vm350_vm1, %v338_v9 }
 0x12f   : > { %v501_v16 = vpop.f32.mrf.mxu1  ;;  %v420_v17 = vpop.f32.mrf.mxu0 }
 0x130   : > { %v502_v18 = vadd.f32 %v878_v14, %v501_v16  ;;  %v421_v19 = vadd.f32 %v876_v15, %v420_v17 }
 0x131   : > { %v929_v20 = vpop.f32.mrf.mxu1  ;;  %v918_v21 = vpop.f32.mrf.mxu0 }
 0x132   : > { %942 = vmatpush3.xpose.msk.msra.mxu1 %vm350_vm1, %v502_v18 }
 0x133   : > { %946 = vmatprep.subr.mxu1 %v1222_v0 }
 0x135   : > { %944 = vmatmul.mubr.msk.f32.vlgmr.msra.gmra.mxu1 %vm350_vm1, %v421_v19 }
 0x136   : > { %948 = vmatprep.mubr.msk.f32.mxu1 %vm1223_vm0, %v1222_v0 }
 0x139   : > { %v582_v26 = vpop.f32.mrf.mxu0 }
 0x13a   : > { %v583_v27 = vadd.f32 %v880_v25, %v582_v26 }
 0x13b   : > { %v940_v28 = vpop.f32.mrf.mxu0 }
 0x13c   : > { %947 = vmatpush3.msra.mxu1 %v583_v27 }
 0x1f5   : > { %v658_v22 = vpop.f32.mrf.mxu1 }
 0x1f6   : > { %v663_v23 = vsel %vm662_vm2, %v658_v22, -inf }
 0x1f7   : > { %664 = vmax.xlane.f32.xlu0 %v663_v23  ;;  %v945_v24 = vpop.f32.mrf.mxu1 }
 0x280   : > { %v665_v29 = vpop.xlane.xlu0 %664 }
 0x281   : > { %v666_v30 = vsub.f32 %v658_v22, %v665_v29 }
 0x283   : > { %v667_v31 = vmul.f32 1.442695, %v666_v30 }
 0x285   : > { %1032 = vpow2.f32 %v667_v31 }
 0x292   : > { %v1033_v32 = vpop.eup %1032 }
 0x293   : > { %949 = vmatmul.mubr.msk.f32.vlgmr.msra.gmra.mxu1 %vm662_vm2, %v1033_v32  ;;  %v669_v33 = vsel %vm662_vm2, %v1033_v32, 0.0 }
 0x294   : > { %670 = vadd.xlane.f32.xlu0 %v669_v33 }
 0x31d   : > { %v671_v34 = vpop.xlane.xlu0 %670 }
 0x31e   : > { %1034 = vrcp.f32 %v671_v34 }
 0x32b   : > { %v1035_v35 = vpop.eup %1034 }
 0x32c   : > { %v746_v36 = vmul.f32 0.17677669, %v1035_v35 }
 0x353   : > { %v741_v37 = vpop.f32.mrf.mxu1 }
 0x354   : > { %v747_v38 = vmul.f32 %v746_v36, %v741_v37 }
 0x355   : > { %v950_v39 = vpop.f32.mrf.mxu1 }
 0x356   : > { %748 = vst.msk [vmem:[%s337_s18] sm:$0xff] %vm350_vm1, %v747_v38 }
 0x357   : > { %1155 = shalt.err (!%p1152_p9)
}
 0x358   : > { %s1156_s9 = scalar_lea.hbm %s1440_s21, 128  ;;  %s1160_s10 = scalar_lea.hbm %s1485_s7, 256 }
 0x359   : > { %p1157_p13 = scmp.ne.s32.totalorder %s1440_s21, %s1156_s9  ;;  %p1161_p11 = scmp.lt.s32.totalorder %s1440_s21, %s1485_s7 }
 0x35a   : > { %p1162_p1 = scmp.lt.s32.totalorder %s1160_s10, %s1156_s9 }
 0x35b   : > { %p1158_p8 = pnand %p1157_p13, %p1507_p6 }
 0x35c   : > { %p1163_p2 = por %p1162_p1, %p1161_p11 }
 0x35d   : > { %p1159_p10 = pneg %p1158_p8 }
 0x35f   : > { %p1164_p4 = pnand %p1163_p2, %p1159_p10 }
 0x361   : > { %1167 = shalt.err (!%p1164_p4)
}
 0x362   : > { %965 = dma.vmem_to_hbm [thread:$0]  (%p1507_p6), %s764_s19, 128, %s1440_s21, %s750_s1  }
 0x363 PF: > { %s775_s22 = sand.u32 1, %s1202_s24   ;;  %p1508_p12 = scmp.ne.s32.totalorder %s1493_s8, 0 }
 0x364   : > { %p1509_p0 = scmp.ge.s32.totalorder %s1214_s27, 2  ;;  %s776_s18 = scalar_lea.sflag [#allocation4], %s775_s22 }
 0x366   : > { %p982_p5 = pnand %p1509_p0, %p1508_p12 }
 0x368   : > { %p983_p3 = pneg %p982_p5 }
 0x36a   : > { %1197 = dma.done.wait (%p983_p3), %s776_s18, 128  }
 0x36b   : > { %1199 = vsyncadd (%p983_p3), %s776_s18, 4294967168  ;;  %p22_p7 = scmp.ge.s32.totalorder %s1345_s14, 4   ;;  %s1510_s24 = smov %s1206_s25 }
 0x36c   : > { %s1511_s25 = smov %s1210_s26  ;;  %s1512_s26 = smov %s1355_s17 }
 0x36d   : > { %s1513_s27 = smov %s1345_s14  ;;  %24 = sbr.rel (!%p22_p7) target bundleno = 10 (0xa), region = 105 }
 0x372   :  { %781 = vsyncpa [#allocation3], 1 }
 0x373   :  { %783 = vsyncpa [#allocation3 + $0x1], 1 }
 0x374   :  { %784 = vsyncpa [#allocation6], 1 }
 0x375   :  { %785 = vsyncpa [#allocation9], 1 }
 0x376   :  { %786 = vsyncpa [#allocation4], 1 }
 0x377   :  { %788 = vsyncpa [#allocation4 + $0x1], 1 }

// kernel: tpu_custom_call.1
= control target key start
LH: loop header
LB: loop body
LE: loop exit
PB: predicated region body
PF: predicated region fallthrough
CT: control target
= control target key end

     0   :  { %s1478_s0 = inlined_call_operand.hbm [shape: f32[2,8,32], index: 0, kind: input, shape index: {}]   ;;  %s1479_s1 = inlined_call_operand.hbm [shape: f32[32,32], index: 1, kind: input, shape index: {}]   ;;  %s1480_s2 = inlined_call_operand.vmem [shape: f32[1,32], index: 2, kind: input, shape index: {}]   ;;  %s1481_s3 = inlined_call_operand.hbm [shape: f32[32,32], index: 3, kind: input, shape index: {}]   ;;  %s1482_s4 = inlined_call_operand.vmem [shape: f32[1,32], index: 4, kind: input, shape index: {}]   ;;  %s1483_s5 = inlined_call_operand.hbm [shape: f32[32,32], index: 5, kind: input, shape index: {}]   ;;  %s1484_s6 = inlined_call_operand.vmem [shape: f32[1,32], index: 6, kind: input, shape index: {}]   ;;  %s1485_s7 = inlined_call_operand.hbm [shape: f32[2,8,32], index: 7, kind: output, shape index: {}]  }
   0x1   :  { %1490 = sst [smem:[#allocation15_spill]] %s1479_s1 }
   0x2   :  { %1491 = sst [smem:[#allocation16_spill]] %s1481_s3 }
   0x3   :  { %12 = vsyncpa [#allocation3], 0 }
   0x4   :  { %14 = vsyncpa [#allocation3 + $0x1], 0 }
   0x5   :  { %15 = vsyncpa [#allocation6], 0 }
   0x6   :  { %16 = vsyncpa [#allocation9], 0 }
   0x7   :  { %17 = vsyncpa [#allocation4], 0 }
   0x8   :  { %19 = vsyncpa [#allocation4 + $0x1], 0  ;;  %s1265_s24 = smov 0   ;;  %s1267_s25 = smov 0  }
   0x9   :  { %s1269_s26 = smov 0   ;;  %s1271_s27 = smov 0  }
   0xa LB: > { %s1286_s28 = sadd.s32 4294967295, %s1214_s27   ;;  %s862_s29 = sadd.s32 4294967294, %s1214_s27   ;;  %s1214_s27 = sphi %s1271_s27, %s1513_s27   ;;  %s1210_s26 = sphi %s1269_s26, %s1512_s26   ;;  %s1206_s25 = sphi %s1267_s25, %s1511_s25   ;;  %s1202_s24 = sphi %s1265_s24, %s1510_s24  }
   0xb   : > { %p45_p0 = scmp.ne.s32.totalorder %s1206_s25, %s1202_s24  ;;  %p1486_p1 = scmp.eq.s32.totalorder %s1286_s28, 0 }
   0xc   : > { %p201_p3 = scmp.eq.s32.totalorder %s862_s29, 1  ;;  %p863_p5 = scmp.ge.s32.totalorder %s1214_s27, 1 }
   0xd   : > { %p1295_p4 = por %p1486_p1, %p45_p0  ;;  %p208_p7 = scmp.lt.s32.totalorder %s1214_s27, 3 }
   0xe   : > { %p1300_p6 = por %p201_p3, %p45_p0  ;;  %s1216_s10 = smov [#allocation5]  }
   0xf   : > { %s1492_s30 = scalar_select %p1295_p4, 1, 0 }
  0x10   : > { %s1493_s8 = scalar_select %p1300_p6, 1, 0 }
  0x11   : > { %p1305_p8 = pnand %p863_p5, %p208_p7  ;;  %s220_s11 = sshll.u32 %s1216_s10, 4  ;;  %s221_s11 = int_to_ptr.vmem [resolvable:$true] %s220_s11 }
  0x12   : > { %s1217_s13 = smov [#allocation7]   ;;  %s1218_s15 = smov [#allocation8]  }
  0x13   : > { %s1494_s9 = scalar_select %p1305_p8, 1, 0 }
  0x14   : > { %p967_p9 = pneg %p1305_p8  ;;  %s236_s14 = sshll.u32 %s1217_s13, 4  ;;  %s237_s14 = int_to_ptr.vmem [resolvable:$true] %s236_s14 }
  0x15   : > { %s252_s16 = sshll.u32 %s1218_s15, 4  ;;  %s1047_s17 = scalar_lea.vmem %s221_s11, 512  ;;  %s253_s16 = int_to_ptr.vmem [resolvable:$true] %s252_s16 }
  0x16   : > { %p1314_p11 = pnand %p967_p9, %p1486_p1  ;;  %p1048_p13 = scmp.ne.s32.totalorder %s221_s11, %s1047_s17 }
  0x17   : > { %p1055_p5 = scmp.lt.s32.totalorder %s221_s11, %s221_s11  ;;  %p1056_p7 = scmp.lt.s32.totalorder %s1047_s17, %s1047_s17 }
  0x18   : > { %p1038_p12 = pneg %p1314_p11 }
  0x19   : > { %p1057_p9 = por %p1056_p7, %p1055_p5 }
  0x1a   : > { %p1050_p0 = pnand %p1048_p13, %p1038_p12 }
  0x1c   : > { %p1051_p3 = pneg %p1050_p0 }
  0x1e   : > { %p1058_p10 = pnand %p1057_p9, %p1051_p3 }
  0x20   : > { %1061 = shalt.err (!%p1058_p10)
}
  0x21   : > { %s1219_s18 = smov 128   ;;  %s1220_s19 = smov 8  }
  0x22   : > { %s1496_s1 = sld [smem:[#allocation15_spill]]  ;;  %s1073_s22 = scalar_lea.vmem %s237_s14, 512 }
  0x23   : > { %p1074_p1 = scmp.ne.s32.totalorder %s237_s14, %s1073_s22  ;;  %p1081_p2 = scmp.lt.s32.totalorder %s237_s14, %s237_s14 }
  0x24   : > { %p1082_p6 = scmp.lt.s32.totalorder %s1073_s22, %s1073_s22 }
  0x25   : > { %p1076_p13 = pnand %p1074_p1, %p1038_p12 }
  0x26   : > { %p1083_p5 = por %p1082_p6, %p1081_p2 }
  0x27   : > { %p1077_p0 = pneg %p1076_p13 }
  0x28   : > { %970 = dma.hbm_to_vmem [thread:$0]  (!%p1314_p11), %s1496_s1, 512, %s221_s11, [#allocation6], %s1219_s18, %s1219_s18, %s1220_s19  }
  0x29   : > { %p1084_p3 = pnand %p1083_p5, %p1077_p0 }
  0x2b   : > { %1087 = shalt.err (!%p1084_p3)
}
  0x2c   : > { %s1497_s3 = sld [smem:[#allocation16_spill]]  ;;  %s1099_s10 = scalar_lea.vmem %s253_s16, 512 }
  0x2d   : > { %p1100_p10 = scmp.ne.s32.totalorder %s253_s16, %s1099_s10  ;;  %p1107_p9 = scmp.lt.s32.totalorder %s253_s16, %s253_s16 }
  0x2e   : > { %p1108_p13 = scmp.lt.s32.totalorder %s1099_s10, %s1099_s10 }
  0x2f   : > { %p1102_p7 = pnand %p1100_p10, %p1038_p12 }
  0x30   : > { %p1109_p4 = por %p1108_p13, %p1107_p9 }
  0x31   : > { %p1103_p1 = pneg %p1102_p7 }
  0x32   : > { %973 = dma.hbm_to_vmem [thread:$0]  (!%p1314_p11), %s1497_s3, 512, %s237_s14, [#allocation6], %s1219_s18, %s1219_s18, %s1220_s19  }
  0x33   : > { %p1110_p2 = pnand %p1109_p4, %p1103_p1 }
  0x35   : > { %1113 = shalt.err (!%p1110_p2)
}
  0x36   : > { %976 = dma.hbm_to_vmem [thread:$0]  (!%p1314_p11), %s1483_s5, 512, %s253_s16, [#allocation9], %s1219_s18, %s1219_s18, %s1220_s19  }
  0x37   : > { %s1345_s14 = sadd.s32 1, %s1214_s27   ;;  %s32_s12 = sadd.s32 1, %s1210_s26 }
  0x38   : > { %s29_s15 = ssub.s32 %s1214_s27, %s1345_s14  ;;  %p39_p6 = scmp.ne.s32.totalorder %s1210_s26, %s1206_s25 }
  0x39   : > { %p30_p4 = scmp.eq.s32.totalorder %s29_s15, 0  ;;  %p40_p12 = scmp.eq.s32.totalorder %s1214_s27, 0 }
  0x3a   : > { %p988_p0 = scmp.lt.s32.totalorder %s1214_s27, 2  ;;  %p1498_p3 = scmp.eq.s32.totalorder %s1286_s28, 1 }
  0x3b   : > { %s1355_s17 = scalar_select %p30_p4, %s1210_s26, %s32_s12  }
  0x3c   : > { %p41_p5 = por %p40_p12, %p39_p6  ;;  %p1359_p10 = por %p1498_p3, %p39_p6 }
  0x3d   : > { %s269_s21 = sand.u32 1, %s1210_s26   ;;  %s869_s22 = sshll.u32 %s1214_s27, 7 }
  0x3e   : > { %s1499_s20 = scalar_select %p1359_p10, 1, 0 }
  0x3f   : > { %s868_s16 = sshll.u32 %s269_s21, 3  ;;  %s1368_s23 = scalar_lea.hbm %s1478_s0, %s869_s22 }
  0x40   : > { %s273_s29 = scalar_lea.vmem [#allocation2], %s868_s16  ;;  %p1370_p11 = pnand %p988_p0, %p41_p5 }
  0x41   : > { %s280_s10 = sshll.u32 %s273_s29, 4  ;;  %s270_s13 = scalar_lea.sflag [#allocation3], %s269_s21  ;;  %s281_s10 = int_to_ptr.vmem [resolvable:$true] %s280_s10 }
  0x42   : > { %s1114_s15 = scalar_lea.hbm %s1368_s23, 128  ;;  %p1116_p1 = pneg %p1370_p11 }
  0x43   : > { %p1115_p7 = scmp.ne.s32.totalorder %s1368_s23, %s1114_s15  ;;  %s1119_s18 = scalar_lea.hbm %s1478_s0, 256 }
  0x44   : > { %p1120_p2 = scmp.lt.s32.totalorder %s1368_s23, %s1478_s0  ;;  %p1121_p4 = scmp.lt.s32.totalorder %s1119_s18, %s1114_s15 }
  0x45   : > { %p1117_p9 = pnand %p1116_p1, %p1115_p7 }
  0x46   : > { %p1122_p6 = por %p1121_p4, %p1120_p2 }
  0x47   : > { %p1118_p13 = pneg %p1117_p9 }
  0x49   : > { %p1123_p12 = pnand %p1122_p6, %p1118_p13 }
  0x4b   : > { %1126 = shalt.err (!%p1123_p12)
}
  0x4c   : > { %s1127_s29 = scalar_lea.vmem %s281_s10, 128  ;;  %s1221_s21 = smov [#allocation2]  }
  0x4d   : > { %p1128_p0 = scmp.ne.s32.totalorder %s281_s10, %s1127_s29  ;;  %s1132_s1 = sshll.u32 %s1221_s21, 4  ;;  %s1133_s1 = int_to_ptr.vmem [resolvable:$false] %s1132_s1 }
  0x4e   : > { %s1134_s3 = scalar_lea.vmem %s1133_s1, 256  ;;  %p1135_p7 = scmp.lt.s32.totalorder %s281_s10, %s1133_s1 }
  0x4f   : > { %p1130_p5 = pnand %p1128_p0, %p1116_p1  ;;  %p1136_p9 = scmp.lt.s32.totalorder %s1134_s3, %s1127_s29 }
  0x51   : > { %p1131_p3 = pneg %p1130_p5  ;;  %p1137_p10 = por %p1136_p9, %p1135_p7 }
  0x53   : > { %p1138_p8 = pnand %p1137_p10, %p1131_p3 }
  0x55   : > { %1141 = shalt.err (!%p1138_p8)
}
  0x56   : > { %980 = dma.hbm_to_vmem [thread:$0]  (!%p1370_p11), %s1368_s23, 128, %s281_s10, %s270_s13  }
  0x57   : > { %p1501_p13 = scmp.ne.s32.totalorder %s1494_s9, 0 }
  0x58   : > { %s1391_s15 = sand.u32 (!%p1501_p13), 1, %s1206_s25   ;;  %p1502_p8 = scmp.ne.s32.totalorder (!%p1501_p13), %s1492_s30, 0 }
  0x59   : > { %289 = sbr.rel (%p1501_p13) target bundleno = 867 (0x363), region = 48  ;;  %s871_s12 = sshll.u32 (!%p1501_p13), %s1391_s15, 3 }
  0x5a   : > { %s292_s1 = scalar_lea.sflag (!%p1501_p13), [#allocation3], %s1391_s15  ;;  %s1397_s3 = scalar_lea.vmem (!%p1501_p13), [#allocation2], %s871_s12 }
  0x5e   : > { %1185 = dma.done.wait (%p1502_p8), %s292_s1, 128  }
  0x5f   : > { %1187 = vsyncadd (%p1502_p8), %s292_s1, 4294967168  ;;  %p1503_p10 = scmp.eq.s32.totalorder %s1286_s28, 0 }
  0x61   : > { %1189 = dma.done.wait (%p1503_p10), [#allocation6], 1024   ;;  %p1504_p11 = pmov %p1503_p10 }
  0x62   : > { %p1505_p1 = pmov %p1503_p10 }
  0x63   : > { %1191 = vsyncadd (%p1504_p11), [#allocation6], 4294966272 }
  0x64   : > { %1193 = dma.done.wait (%p1505_p1), [#allocation9], 512   ;;  %p1506_p2 = pmov %p1505_p1 }
  0x65   : > { %v1222_v0 = vmov 0.0   ;;  %vm1223_vm0 = vmmov 0   ;;  %v427_v1 = vld [vmem:[#allocation7 + $0x18] sm:$0xff]  ;;  %v426_v3 = vld [vmem:[#allocation7 + $0x10] sm:$0xff]  ;;  %v425_v5 = vld [vmem:[#allocation7 + $0x8] sm:$0xff]  ;;  %vm350_vm1 = vcmask 261120  }
  0x66   : > { %1195 = vsyncadd (%p1506_p2), [#allocation9], 4294966784  ;;  %919 = vmatprep.subr.mxu1 %v1222_v0  ;;  %908 = vmatprep.subr.mxu0 %v1222_v0  ;;  %v342_v2 = vld [vmem:[#allocation5 + $0x18] sm:$0xff]  ;;  %v341_v4 = vld [vmem:[#allocation5 + $0x10] sm:$0xff]  ;;  %vm662_vm2 = vcmask 64512   ;;  %s886_s22 = sshll.u32 %s1286_s28, 7 }
  0x67   : > { %927 = vmatprep.mubr.msk.f32.mxu1 %vm1223_vm0, %v1222_v0  ;;  %916 = vmatprep.mubr.msk.f32.mxu0 %vm1223_vm0, %v1222_v0  ;;  %v340_v6 = vld [vmem:[#allocation5 + $0x8] sm:$0xff]  ;;  %v424_v7 = vld [vmem:[#allocation7] sm:$0xff]  ;;  %v338_v9 = vld [vmem:[%s1397_s3] sm:$0xff]  ;;  %s337_s18 = scalar_lea.vmem [#allocation10], %s871_s12  ;;  %s1440_s21 = scalar_lea.hbm %s1485_s7, %s886_s22 }
  0x68   : > { %920 = vmatpush3.msra.mxu1 %v427_v1  ;;  %909 = vmatpush3.msra.mxu0 %v342_v2  ;;  %v339_v8 = vld [vmem:[#allocation5] sm:$0xff]  ;;  %v508_v10 = vld [vmem:[#allocation8 + $0x18] sm:$0xff]  ;;  %v507_v11 = vld [vmem:[#allocation8 + $0x10] sm:$0xff]  ;;  %s763_s19 = sshll.u32 %s337_s18, 4  ;;  %s750_s1 = scalar_lea.sflag [#allocation4], %s1391_s15  ;;  %s764_s19 = int_to_ptr.vmem [resolvable:$true] %s763_s19 }
  0x69   : > { %921 = vmatprep.subr.mxu1 %v1222_v0  ;;  %910 = vmatprep.subr.mxu0 %v1222_v0  ;;  %v506_v12 = vld [vmem:[#allocation8 + $0x8] sm:$0xff]  ;;  %v505_v13 = vld [vmem:[#allocation8] sm:$0xff]  ;;  %v878_v14 = vld [vmem:[%s1482_s4] ss:$0 sm:$0xff]  ;;  %s1142_s3 = scalar_lea.vmem %s764_s19, 128  ;;  %p1507_p6 = scmp.ne.s32.totalorder %s1499_s20, 0 }
  0x6a   : > { %922 = vmatpush3.msra.mxu1 %v426_v3  ;;  %911 = vmatpush3.msra.mxu0 %v341_v4  ;;  %v876_v15 = vld [vmem:[%s1480_s2] ss:$0 sm:$0xff]  ;;  %p1143_p4 = scmp.ne.s32.totalorder %s764_s19, %s1142_s3  ;;  %s1224_s28 = smov [#allocation10]  }
  0x6b   : > { %923 = vmatprep.subr.mxu1 %v1222_v0  ;;  %912 = vmatprep.subr.mxu0 %v1222_v0  ;;  %v880_v25 = vld [vmem:[%s1484_s6] ss:$0 sm:$0xff]  ;;  %s1146_s12 = sshll.u32 %s1224_s28, 4  ;;  %s1147_s12 = int_to_ptr.vmem [resolvable:$false] %s1146_s12 }
  0x6c   : > { %924 = vmatpush3.msra.mxu1 %v425_v5  ;;  %913 = vmatpush3.msra.mxu0 %v340_v6  ;;  %p1144_p12 = pnand %p1143_p4, %p1507_p6  ;;  %s1148_s30 = scalar_lea.vmem %s1147_s12, 256 }
  0x6d   : > { %925 = vmatprep.subr.mxu1 %v1222_v0  ;;  %914 = vmatprep.subr.mxu0 %v1222_v0  ;;  %p1149_p5 = scmp.lt.s32.totalorder %s764_s19, %s1147_s12  ;;  %p1150_p3 = scmp.lt.s32.totalorder %s1148_s30, %s1142_s3 }
  0x6e   : > { %926 = vmatpush3.msra.mxu1 %v424_v7  ;;  %915 = vmatpush3.msra.mxu0 %v339_v8  ;;  %p1145_p0 = pneg %p1144_p12 }
  0x6f   : > { %928 = vmatmul.mubr.msk.f32.vlgmr.msra.gmra.mxu1 %vm350_vm1, %v338_v9  ;;  %917 = vmatmul.mubr.msk.f32.vlgmr.msra.gmra.mxu0 %vm350_vm1, %v338_v9  ;;  %p1151_p7 = por %p1150_p3, %p1149_p5 }
  0x70   : > { %941 = vmatprep.subr.mxu1 %v1222_v0  ;;  %943 = vmatprep.mubr.msk.f32.mxu1 %vm1223_vm0, %v1222_v0 }
  0x71   : > { %930 = vmatprep.subr.mxu0 %v1222_v0  ;;  %938 = vmatprep.mubr.msk.f32.mxu0 %vm1223_vm0, %v1222_v0  ;;  %p1152_p9 = pnand %p1151_p7, %p1145_p0 }
  0x72   : > { %931 = vmatpush3.msra.mxu0 %v508_v10 }
  0x73   : > { %932 = vmatprep.subr.mxu0 %v1222_v0 }
  0x74   : > { %933 = vmatpush3.msra.mxu0 %v507_v11 }
  0x75   : > { %934 = vmatprep.subr.mxu0 %v1222_v0 }
  0x76   : > { %935 = vmatpush3.msra.mxu0 %v506_v12 }
  0x77   : > { %936 = vmatprep.subr.mxu0 %v1222_v0 }
  0x78   : > { %937 = vmatpush3.msra.mxu0 %v505_v13 }
  0x79   : > { %939 = vmatmul.mubr.msk.f32.vlgmr.msra.gmra.mxu0 %vm350_vm1, %v338_v9 }
 0x12f   : > { %v501_v16 = vpop.f32.mrf.mxu1  ;;  %v420_v17 = vpop.f32.mrf.mxu0 }
 0x130   : > { %v502_v18 = vadd.f32 %v878_v14, %v501_v16  ;;  %v421_v19 = vadd.f32 %v876_v15, %v420_v17 }
 0x131   : > { %v929_v20 = vpop.f32.mrf.mxu1  ;;  %v918_v21 = vpop.f32.mrf.mxu0 }
 0x132   : > { %942 = vmatpush3.xpose.msk.msra.mxu1 %vm350_vm1, %v502_v18 }
 0x133   : > { %946 = vmatprep.subr.mxu1 %v1222_v0 }
 0x135   : > { %944 = vmatmul.mubr.msk.f32.vlgmr.msra.gmra.mxu1 %vm350_vm1, %v421_v19 }
 0x136   : > { %948 = vmatprep.mubr.msk.f32.mxu1 %vm1223_vm0, %v1222_v0 }
 0x139   : > { %v582_v26 = vpop.f32.mrf.mxu0 }
 0x13a   : > { %v583_v27 = vadd.f32 %v880_v25, %v582_v26 }
 0x13b   : > { %v940_v28 = vpop.f32.mrf.mxu0 }
 0x13c   : > { %947 = vmatpush3.msra.mxu1 %v583_v27 }
 0x1f5   : > { %v658_v22 = vpop.f32.mrf.mxu1 }
 0x1f6   : > { %v663_v23 = vsel %vm662_vm2, %v658_v22, -inf }
 0x1f7   : > { %664 = vmax.xlane.f32.xlu0 %v663_v23  ;;  %v945_v24 = vpop.f32.mrf.mxu1 }
 0x280   : > { %v665_v29 = vpop.xlane.xlu0 %664 }
 0x281   : > { %v666_v30 = vsub.f32 %v658_v22, %v665_v29 }
 0x283   : > { %v667_v31 = vmul.f32 1.442695, %v666_v30 }
 0x285   : > { %1032 = vpow2.f32 %v667_v31 }
 0x292   : > { %v1033_v32 = vpop.eup %1032 }
 0x293   : > { %949 = vmatmul.mubr.msk.f32.vlgmr.msra.gmra.mxu1 %vm662_vm2, %v1033_v32  ;;  %v669_v33 = vsel %vm662_vm2, %v1033_v32, 0.0 }
 0x294   : > { %670 = vadd.xlane.f32.xlu0 %v669_v33 }
 0x31d   : > { %v671_v34 = vpop.xlane.xlu0 %670 }
 0x31e   : > { %1034 = vrcp.f32 %v671_v34 }
 0x32b   : > { %v1035_v35 = vpop.eup %1034 }
 0x32c   : > { %v746_v36 = vmul.f32 0.17677669, %v1035_v35 }
 0x353   : > { %v741_v37 = vpop.f32.mrf.mxu1 }
 0x354   : > { %v747_v38 = vmul.f32 %v746_v36, %v741_v37 }
 0x355   : > { %v950_v39 = vpop.f32.mrf.mxu1 }
 0x356   : > { %748 = vst.msk [vmem:[%s337_s18] sm:$0xff] %vm350_vm1, %v747_v38 }
 0x357   : > { %1155 = shalt.err (!%p1152_p9)
}
 0x358   : > { %s1156_s9 = scalar_lea.hbm %s1440_s21, 128  ;;  %s1160_s10 = scalar_lea.hbm %s1485_s7, 256 }
 0x359   : > { %p1157_p13 = scmp.ne.s32.totalorder %s1440_s21, %s1156_s9  ;;  %p1161_p11 = scmp.lt.s32.totalorder %s1440_s21, %s1485_s7 }
 0x35a   : > { %p1162_p1 = scmp.lt.s32.totalorder %s1160_s10, %s1156_s9 }
 0x35b   : > { %p1158_p8 = pnand %p1157_p13, %p1507_p6 }
 0x35c   : > { %p1163_p2 = por %p1162_p1, %p1161_p11 }
 0x35d   : > { %p1159_p10 = pneg %p1158_p8 }
 0x35f   : > { %p1164_p4 = pnand %p1163_p2, %p1159_p10 }
 0x361   : > { %1167 = shalt.err (!%p1164_p4)
}
 0x362   : > { %965 = dma.vmem_to_hbm [thread:$0]  (%p1507_p6), %s764_s19, 128, %s1440_s21, %s750_s1  }
 0x363 PF: > { %s775_s22 = sand.u32 1, %s1202_s24   ;;  %p1508_p12 = scmp.ne.s32.totalorder %s1493_s8, 0 }
 0x364   : > { %p1509_p0 = scmp.ge.s32.totalorder %s1214_s27, 2  ;;  %s776_s18 = scalar_lea.sflag [#allocation4], %s775_s22 }
 0x366   : > { %p982_p5 = pnand %p1509_p0, %p1508_p12 }
 0x368   : > { %p983_p3 = pneg %p982_p5 }
 0x36a   : > { %1197 = dma.done.wait (%p983_p3), %s776_s18, 128  }
 0x36b   : > { %1199 = vsyncadd (%p983_p3), %s776_s18, 4294967168  ;;  %p22_p7 = scmp.ge.s32.totalorder %s1345_s14, 4   ;;  %s1510_s24 = smov %s1206_s25 }
 0x36c   : > { %s1511_s25 = smov %s1210_s26  ;;  %s1512_s26 = smov %s1355_s17 }
 0x36d   : > { %s1513_s27 = smov %s1345_s14  ;;  %24 = sbr.rel (!%p22_p7) target bundleno = 10 (0xa), region = 105 }
 0x372   :  { %781 = vsyncpa [#allocation3], 1 }
 0x373   :  { %783 = vsyncpa [#allocation3 + $0x1], 1 }
 0x374   :  { %784 = vsyncpa [#allocation6], 1 }
 0x375   :  { %785 = vsyncpa [#allocation9], 1 }
 0x376   :  { %786 = vsyncpa [#allocation4], 1 }
 0x377   :  { %788 = vsyncpa [#allocation4 + $0x1], 1 }

</bundles_post_ra>
